<compile_context>
chip_gen: v5e
topology: v5e:2x2
jax: 0.10.0
libtpu: 0.0.40
codegen_flags: <defaults>
</compile_context>

<pallas_src>
import functools

import jax
import jax.numpy as jnp
from jax import lax
from jax.experimental import pallas as pl
from jax.experimental.pallas import tpu as pltpu


_VMEM_TILE_BUDGET = 8 * 1024 * 1024   # double-buffered logits block budget (v7x-safe)


def _round_up(x, m):
    return ((x + m - 1) // m) * m


def _pick_tile_n(n, c, itemsize):
    """Point-axis DMA tile: as large (and lane-dense) as fits the block budget."""
    if n <= 1024:
        return n                                   # full-dim block is always legal
    # Prefer one contiguous block per batch (TN == N) when it fits.
    if n % 128 == 0 and n <= 8192 and 2 * c * n * itemsize <= _VMEM_TILE_BUDGET:
        return n
    ncap = _round_up(n, 128)
    for t in (8192, 4096, 2048, 1024, 512, 256, 128):
        if t < ncap and 2 * c * t * itemsize <= _VMEM_TILE_BUDGET:
            return t
    return 128


def _pick_chunk(tn):
    """Lane chunk for the in-VMEM compute loop (bounds the vreg working set)."""
    if tn <= 1024:
        return tn
    for c in (1024, 512, 256, 128):
        if tn % c == 0:
            return c
    return tn  # unreachable: tn > 1024 implies tn % 128 == 0 by construction


def _part_seg_ce_kernel(n_valid, inv_total, nj, chunk, n_chunks, unroll,
                        logits_ref, labels_ref, out_ref, acc_ref, rows_ref):
    j = pl.program_id(2)
    tn = logits_ref.shape[2]

    @pl.when(j == 0)
    def _():
        acc_ref[...] = jnp.zeros_like(acc_ref)
        # Class-index iota hoisted out of the per-tile loop (reused every step).
        rows_ref[...] = lax.broadcasted_iota(jnp.int32, rows_ref.shape, 0)

    base = (pl.program_id(1) * nj + j) * tn            # logical point-axis offset
    lane = lax.broadcasted_iota(jnp.int32, (1, chunk), 1)   # hoisted out of the loop

    def step(off, x_raw, lbl):
        x = x_raw.astype(jnp.float32)                               # (C, chunk)
        # Numerically stable log-softmax over the class (sublane) axis.
        m = jnp.max(x, axis=0, keepdims=True)                       # (1, chunk)
        lse = m + jnp.log(jnp.sum(jnp.exp(x - m), axis=0, keepdims=True))
        # Gather logits[label] via iota == label mask (no dynamic gather on TPU).
        picked = jnp.sum(jnp.where(rows_ref[...] == lbl, x, 0.0),
                         axis=0, keepdims=True)                     # (1, chunk)
        # Ragged-tail mask fused into a single where-select, so OOB garbage/NaN
        # in padded columns cannot propagate.  Lane-wide accumulation (no
        # per-step cross-lane reduce).
        cols = base + off + lane
        acc_ref[...] += jnp.where(cols < n_valid, lse - picked, 0.0)

    if n_chunks == 1:
        step(0, logits_ref[0], labels_ref[0])
    else:
        def body(i, carry):
            off = pl.multiple_of(i * chunk, chunk)
            step(off,
                 logits_ref[0, :, pl.ds(off, chunk)],
                 labels_ref[0, :, pl.ds(off, chunk)])
            return carry
        lax.fori_loop(0, n_chunks, body, 0, unroll=unroll)

    @pl.when(j == pl.num_programs(2) - 1)
    def _():
        tot = jnp.sum(acc_ref[...], axis=1, keepdims=True)          # (1, 1)
        out_ref[0] = (tot * inv_total).astype(out_ref.dtype)


def part_seg_loss(logits, y, eps=0.2):
    """CrossEntropy (mean) over logits [B, C, N] and integer targets y [B, N] or [B*N]."""
    del eps  # TODO(synk): reference stores eps but nn.CrossEntropyLoss() never applies it.
    B, C, N = logits.shape
    labels = y.reshape(B, 1, N)
    if labels.dtype != jnp.int32:
        labels = labels.astype(jnp.int32)

    itemsize = jnp.dtype(logits.dtype).itemsize    # bf16 logits stream half the HBM bytes
    tn = _pick_tile_n(N, C, itemsize)
    chunk = _pick_chunk(tn)
    n_chunks = tn // chunk
    unroll = n_chunks <= 8

    n_blocks = pl.cdiv(N, tn)
    # Feed both TensorCores even at batch 1 / odd batch: extra parallel split of
    # the point axis (only when it divides evenly -> no fully-OOB blocks).
    n_split = 2 if (B % 2 == 1 and n_blocks >= 2 and n_blocks % 2 == 0) else 1
    nj = n_blocks // n_split

    logits_spec_kwargs = {}
    if tn <= 512 and nj >= 4:
        # Small tiles expose DMA latency / per-step overhead: deepen the pipeline.
        logits_spec_kwargs["pipeline_mode"] = pl.Buffered(3)

    partials = pl.pallas_call(
        functools.partial(_part_seg_ce_kernel, N, 1.0 / float(B * N),
                          nj, chunk, n_chunks, unroll),
        out_shape=jax.ShapeDtypeStruct((B * n_split, 1, 1), jnp.float32),
        grid=(B, n_split, nj),
        in_specs=[
            pl.BlockSpec((1, C, tn), lambda b, s, j: (b, 0, s * nj + j),
                         **logits_spec_kwargs),
            pl.BlockSpec((1, 1, tn), lambda b, s, j: (b, 0, s * nj + j)),
        ],
        out_specs=pl.BlockSpec((1, 1, 1), lambda b, s, j: (b * n_split + s, 0, 0)),
        scratch_shapes=[
            pltpu.VMEM((1, chunk), jnp.float32),     # lane-wide loss accumulator
            pltpu.VMEM((C, chunk), jnp.int32),       # hoisted class-index iota
        ],
        compiler_params=pltpu.CompilerParams(
            dimension_semantics=("parallel", "parallel", "arbitrary"),
            vmem_limit_bytes=32 * 1024 * 1024),
    )(logits, labels)
    return jnp.sum(partials)


if __name__ == "__main__":
    key = jax.random.PRNGKey(0)

    def reference(lg, yy):
        logp = jax.nn.log_softmax(
            jnp.transpose(lg, (0, 2, 1)).astype(jnp.float32), axis=-1)
        yy = yy.reshape(lg.shape[0], lg.shape[2])
        return -jnp.mean(jnp.take_along_axis(logp, yy[..., None], axis=-1))

    # Small shape consistent with the module: [B, num_classes, N_points].
    k1, k2, k3, k4 = jax.random.split(key, 4)
    B, C, N = 2, 16, 64
    logits = jax.random.normal(k1, (B, C, N), jnp.float32)
    y = jax.random.randint(k2, (B, N), 0, C, jnp.int32)
    loss = jax.jit(part_seg_loss)(logits, y)
    jax.block_until_ready(loss)
    ref = reference(logits, y)
    assert jnp.allclose(loss, ref, rtol=1e-5, atol=1e-6), (float(loss), float(ref))

    # Second shape exercising multi-block tiles, ragged tail, in-tile chunking
    # and the batch-1 megacore point-axis split.
    B2, C2, N2 = 1, 8, 4000
    logits2 = jax.random.normal(k3, (B2, C2, N2), jnp.float32)
    y2 = jax.random.randint(k4, (B2, N2), 0, C2, jnp.int32)
    loss2 = jax.jit(part_seg_loss)(logits2, y2)
    jax.block_until_ready(loss2)
    ref2 = reference(logits2, y2)
    assert jnp.allclose(loss2, ref2, rtol=5e-5, atol=1e-5), (float(loss2), float(ref2))

    print("KERNEL_OK")
</pallas_src>

<mosaic_0001>
module attributes {stable_mosaic.version = 11 : i64} {
  func.func @_part_seg_ce_kernel(%arg0: i32, %arg1: i32, %arg2: i32, %arg3: memref<1x16x64xf32, #tpu.memory_space<vmem>>, %arg4: memref<1x1x64xi32, #tpu.memory_space<vmem>>, %arg5: memref<1x1x1xf32, #tpu.memory_space<vmem>>, %arg6: memref<1x64xf32, #tpu.memory_space<vmem>>, %arg7: memref<16x64xi32, #tpu.memory_space<vmem>>) attributes {dimension_semantics = [#tpu.dimension_semantics<parallel>, #tpu.dimension_semantics<parallel>, #tpu.dimension_semantics<arbitrary>], iteration_bounds = array<i64: 2, 1, 1>, scalar_prefetch = 0 : i64, scratch_operands = 2 : i64, tpu.core_type = #tpu.core_type<tc>, window_params = [{transform_indices = @transform_0, window_bounds = array<i64: 1, 16, 64>}, {transform_indices = @transform_1, window_bounds = array<i64: 1, 1, 64>}, {transform_indices = @transform_2, window_bounds = array<i64: 1, 1, 1>}]} {
    %c0_i32 = arith.constant 0 : i32
    %0 = arith.cmpi eq, %arg2, %c0_i32 : i32
    %1 = arith.extui %0 : i1 to i32
    %c0_i32_0 = arith.constant 0 : i32
    %2 = arith.cmpi ne, %1, %c0_i32_0 : i32
    scf.if %2 {
      %cst_20 = arith.constant 0.000000e+00 : f32
      %41 = vector.broadcast %cst_20 : f32 to vector<1x64xf32>
      %c0_21 = arith.constant 0 : index
      %c0_22 = arith.constant 0 : index
      %42 = vector.load %arg6[%c0_21, %c0_22] : memref<1x64xf32, #tpu.memory_space<vmem>>, vector<1x64xf32>
      tpu.vector_store %arg6[%c0_21, %c0_22], %41 {strides = array<i32>} : memref<1x64xf32, #tpu.memory_space<vmem>>, vector<1x64xf32>,
      %43 = tpu.iota {dimensions = array<i32: 0>} : vector<16x64xi32>
      %c0_23 = arith.constant 0 : index
      %c0_24 = arith.constant 0 : index
      %44 = vector.load %arg7[%c0_23, %c0_24] : memref<16x64xi32, #tpu.memory_space<vmem>>, vector<16x64xi32>
      tpu.vector_store %arg7[%c0_23, %c0_24], %43 {strides = array<i32>} : memref<16x64xi32, #tpu.memory_space<vmem>>, vector<16x64xi32>,
    } else {
    }
    %c1_i32 = arith.constant 1 : i32
    %3 = arith.muli %arg1, %c1_i32 : i32
    %4 = arith.addi %3, %arg2 : i32
    %c64_i32 = arith.constant 64 : i32
    %5 = arith.muli %4, %c64_i32 : i32
    %6 = tpu.iota {dimensions = array<i32: 1>} : vector<1x64xi32>
    %c0 = arith.constant 0 : index
    %c0_1 = arith.constant 0 : index
    %c0_2 = arith.constant 0 : index
    %7 = vector.load %arg3[%c0, %c0_1, %c0_2] : memref<1x16x64xf32, #tpu.memory_space<vmem>>, vector<1x16x64xf32>
    %8 = vector.shape_cast %7 : vector<1x16x64xf32> to vector<16x64xf32>
    %c0_3 = arith.constant 0 : index
    %c0_4 = arith.constant 0 : index
    %c0_5 = arith.constant 0 : index
    %9 = vector.load %arg4[%c0_3, %c0_4, %c0_5] : memref<1x1x64xi32, #tpu.memory_space<vmem>>, vector<1x1x64xi32>
    %10 = vector.shape_cast %9 : vector<1x1x64xi32> to vector<1x64xi32>
    %cst = arith.constant dense<0xFF800000> : vector<64xf32>
    %11 = vector.multi_reduction <maximumf>, %8, %cst [0] : vector<16x64xf32> to vector<64xf32>
    %12 = vector.shape_cast %11 : vector<64xf32> to vector<1x64xf32>
    %13 = vector.broadcast %12 : vector<1x64xf32> to vector<16x64xf32>
    %14 = arith.subf %8, %13 : vector<16x64xf32>
    %15 = math.exp %14 : vector<16x64xf32>
    %cst_6 = arith.constant dense<0.000000e+00> : vector<64xf32>
    %16 = vector.multi_reduction <add>, %15, %cst_6 [0] : vector<16x64xf32> to vector<64xf32>
    %17 = vector.shape_cast %16 : vector<64xf32> to vector<1x64xf32>
    %18 = math.log %17 : vector<1x64xf32>
    %19 = arith.addf %12, %18 : vector<1x64xf32>
    %c0_7 = arith.constant 0 : index
    %c0_8 = arith.constant 0 : index
    %20 = vector.load %arg7[%c0_7, %c0_8] : memref<16x64xi32, #tpu.memory_space<vmem>>, vector<16x64xi32>
    %21 = vector.broadcast %10 : vector<1x64xi32> to vector<16x64xi32>
    %22 = arith.cmpi eq, %20, %21 : vector<16x64xi32>
    %cst_9 = arith.constant 0.000000e+00 : f32
    %23 = vector.broadcast %cst_9 : f32 to vector<16x64xf32>
    %24 = arith.select %22, %8, %23 : vector<16x64xi1>, vector<16x64xf32>
    %cst_10 = arith.constant dense<0.000000e+00> : vector<64xf32>
    %25 = vector.multi_reduction <add>, %24, %cst_10 [0] : vector<16x64xf32> to vector<64xf32>
    %26 = vector.shape_cast %25 : vector<64xf32> to vector<1x64xf32>
    %c0_i32_11 = arith.constant 0 : i32
    %27 = arith.addi %5, %c0_i32_11 : i32
    %28 = vector.broadcast %27 : i32 to vector<1x64xi32>
    %29 = arith.addi %28, %6 : vector<1x64xi32>
    %c0_12 = arith.constant 0 : index
    %c0_13 = arith.constant 0 : index
    %30 = vector.load %arg6[%c0_12, %c0_13] : memref<1x64xf32, #tpu.memory_space<vmem>>, vector<1x64xf32>
    %c64_i32_14 = arith.constant 64 : i32
    %31 = vector.broadcast %c64_i32_14 : i32 to vector<1x64xi32>
    %32 = arith.cmpi slt, %29, %31 : vector<1x64xi32>
    %33 = arith.subf %19, %26 : vector<1x64xf32>
    %cst_15 = arith.constant 0.000000e+00 : f32
    %34 = vector.broadcast %cst_15 : f32 to vector<1x64xf32>
    %35 = arith.select %32, %33, %34 : vector<1x64xi1>, vector<1x64xf32>
    %36 = arith.addf %30, %35 : vector<1x64xf32>
    %c0_16 = arith.constant 0 : index
    %c0_17 = arith.constant 0 : index
    %37 = vector.load %arg6[%c0_16, %c0_17] : memref<1x64xf32, #tpu.memory_space<vmem>>, vector<1x64xf32>
    tpu.vector_store %arg6[%c0_16, %c0_17], %36 {strides = array<i32>} : memref<1x64xf32, #tpu.memory_space<vmem>>, vector<1x64xf32>,
    %c0_i32_18 = arith.constant 0 : i32
    %38 = arith.cmpi eq, %arg2, %c0_i32_18 : i32
    %39 = arith.extui %38 : i1 to i32
    %c0_i32_19 = arith.constant 0 : i32
    %40 = arith.cmpi ne, %39, %c0_i32_19 : i32
    scf.if %40 {
      %c0_20 = arith.constant 0 : index
      %c0_21 = arith.constant 0 : index
      %41 = vector.load %arg6[%c0_20, %c0_21] : memref<1x64xf32, #tpu.memory_space<vmem>>, vector<1x64xf32>
      %cst_22 = arith.constant dense<0.000000e+00> : vector<1xf32>
      %42 = vector.multi_reduction <add>, %41, %cst_22 [1] : vector<1x64xf32> to vector<1xf32>
      %43 = vector.shape_cast %42 : vector<1xf32> to vector<1x1xf32>
      %cst_23 = arith.constant 7.812500e-03 : f32
      %44 = vector.broadcast %cst_23 : f32 to vector<1x1xf32>
      %45 = arith.mulf %43, %44 : vector<1x1xf32>
      %c0_24 = arith.constant 0 : index
      %c0_25 = arith.constant 0 : index
      %c0_26 = arith.constant 0 : index
      %46 = vector.load %arg5[%c0_24, %c0_25, %c0_26] : memref<1x1x1xf32, #tpu.memory_space<vmem>>, vector<1x1x1xf32>
      %47 = vector.shape_cast %46 : vector<1x1x1xf32> to vector<1x1xf32>
      %48 = vector.shape_cast %45 : vector<1x1xf32> to vector<1x1x1xf32>
      tpu.vector_store %arg5[%c0_24, %c0_25, %c0_26], %48 {strides = array<i32>} : memref<1x1x1xf32, #tpu.memory_space<vmem>>, vector<1x1x1xf32>,
    } else {
    }
    return
  }
  func.func @transform_0(%arg0: i32, %arg1: i32, %arg2: i32) -> (i32, i32, i32) {
    %c1_i32 = arith.constant 1 : i32
    %0 = arith.muli %arg1, %c1_i32 : i32
    %1 = arith.addi %0, %arg2 : i32
    %c0_i32 = arith.constant 0 : i32
    %c0_i32_0 = arith.constant 0 : i32
    return %arg0, %c0_i32, %1 : i32, i32, i32
  }
  func.func @transform_1(%arg0: i32, %arg1: i32, %arg2: i32) -> (i32, i32, i32) {
    %c1_i32 = arith.constant 1 : i32
    %0 = arith.muli %arg1, %c1_i32 : i32
    %1 = arith.addi %0, %arg2 : i32
    %c0_i32 = arith.constant 0 : i32
    %c0_i32_0 = arith.constant 0 : i32
    return %arg0, %c0_i32, %1 : i32, i32, i32
  }
  func.func @transform_2(%arg0: i32, %arg1: i32, %arg2: i32) -> (i32, i32, i32) {
    %c1_i32 = arith.constant 1 : i32
    %0 = arith.muli %arg0, %c1_i32 : i32
    %1 = arith.addi %0, %arg1 : i32
    %c0_i32 = arith.constant 0 : i32
    %c0_i32_0 = arith.constant 0 : i32
    %c0_i32_1 = arith.constant 0 : i32
    return %1, %c0_i32, %c0_i32_0 : i32, i32, i32
  }
}

</mosaic_0001>

<bundles_post_ra>
// kernel: part_seg_loss.1
= control target key start
LH: loop header
LB: loop body
LE: loop exit
PB: predicated region body
PF: predicated region fallthrough
CT: control target
= control target key end

     0   :  { %7 = vsyncpa [#allocation5], 0  ;;  %s751_s0 = inlined_call_operand.hbm [shape: f32[2,16,64], index: 0, kind: input, shape index: {}]   ;;  %s752_s1 = inlined_call_operand.hbm [shape: s32[2,1,64], index: 1, kind: input, shape index: {}]   ;;  %s753_s2 = inlined_call_operand.vmem [shape: f32[2,1,1], index: 2, kind: output, shape index: {}]  }
   0x1   :  { %9 = vsyncpa [#allocation5 + $0x1], 0 }
   0x2   :  { %10 = vsyncpa [#allocation7], 0 }
   0x3   :  { %12 = vsyncpa [#allocation7 + $0x1], 0  ;;  %s630_s9 = smov 0   ;;  %s632_s10 = smov 0  }
   0x4   :  { %s634_s11 = smov 0   ;;  %s636_s12 = smov 0  }
   0x5   :  { %s638_s13 = smov 0   ;;  %s640_s14 = smov 0  }
   0x6 LB: > { %s414_s15 = sadd.s32 4294967295, %s610_s14   ;;  %s37_s16 = sadd.s32 1, %s606_s13  ;;  %s610_s14 = sphi %s640_s14, %s18_s14   ;;  %s606_s13 = sphi %s638_s13, %s761_s13   ;;  %s602_s12 = sphi %s636_s12, %s760_s12   ;;  %s598_s11 = sphi %s634_s11, %s759_s11   ;;  %s594_s10 = sphi %s632_s10, %s758_s10   ;;  %s590_s9 = sphi %s630_s9, %s757_s9  }
   0x7   : > { %p39_p0 = scmp.ge.s32.totalorder %s37_s16, 2  ;;  %s48_s17 = sadd.s32 1, %s598_s11 }
   0x8   : > { %p55_p1 = scmp.ne.s32.totalorder %s598_s11, %s594_s10  ;;  %p56_p2 = scmp.eq.s32.totalorder %s610_s14, 0 }
   0x9   : > { %s763_s16 = smov (%p39_p0, %s37_s16), 0  ;;  %p61_p4 = scmp.ne.s32.totalorder %s594_s10, %s590_s9 }
   0xa   : > { %p666_p3 = por %p56_p2, %p55_p1  ;;  %s43_s19 = ssub.s32 %s606_s13, %s763_s16 }
   0xb   : > { %p62_p5 = scmp.eq.s32.totalorder %s414_s15, 0  ;;  %p46_p6 = scmp.eq.s32.totalorder %s43_s19, 0 }
   0xc   : > { %p437_p8 = scmp.lt.s32.totalorder %s610_s14, 2  ;;  %s143_s22 = sand.u32 1, %s598_s11  }
   0xd   : > { %p673_p7 = por %p62_p5, %p61_p4  ;;  %s425_s23 = sshll.u32 %s606_s13, 4 }
   0xe   : > { %s679_s21 = scalar_select %p46_p6, %s598_s11, %s48_s17  }
   0xf   : > { %s418_s24 = sshll.u32 %s143_s22, 4  ;;  %s154_s27 = scalar_lea.hbm %s751_s0, %s425_s23 }
  0x10   : > { %s155_s28 = sshll.u32 %s154_s27, 4  ;;  %s147_s29 = scalar_lea.vmem [#allocation4], %s418_s24  ;;  %s156_s28 = int_to_ptr.hbm [resolvable:$true] %s155_s28 }
  0x11   : > { %s157_s30 = sshll.u32 %s147_s29, 4  ;;  %p688_p9 = pnand %p437_p8, %p666_p3  ;;  %s158_s30 = int_to_ptr.vmem [resolvable:$true] %s157_s30 }
  0x12   : > { %p421_p10 = scmp.ge.s32.totalorder %s610_s14, 1  ;;  %p184_p11 = scmp.lt.s32.totalorder %s610_s14, 3 }
  0x13   : > { %s144_s4 = scalar_lea.sflag [#allocation5], %s143_s22  ;;  %s612_s5 = smov 128  }
  0x14   : > { %s613_s6 = smov 8   ;;  %p185_p12 = pnand %p421_p10, %p184_p11 }
  0x15   : > { %433 = dma.hbm_to_vmem [thread:$0]  (!%p688_p9), %s156_s28, 256, %s158_s30, %s144_s4, %s612_s5, %s612_s5, %s613_s6  }
  0x16   : > { %s175_s9 = scalar_lea.hbm %s752_s1, %s606_s13  ;;  %s170_s17 = scalar_lea.vmem [#allocation6], %s143_s22 }
  0x17   : > { %s177_s15 = sshll.u32 %s175_s9, 4  ;;  %s179_s18 = sshll.u32 %s170_s17, 4  ;;  %s178_s15 = int_to_ptr.hbm [resolvable:$true] %s177_s15  ;;  %s180_s18 = int_to_ptr.vmem [resolvable:$true] %s179_s18 }
  0x18   : > { %s168_s19 = scalar_lea.sflag [#allocation7], %s143_s22  ;;  %188 = sbr.rel (%p185_p12) target bundleno = 219 (0xdb), region = 28 }
  0x19   : > { %436 = dma.hbm_to_vmem [thread:$0]  (!%p688_p9), %s178_s15, 16, %s180_s18, %s168_s19  }
  0x1a   : > { %s703_s23 = sand.u32 (!%p185_p12), 1, %s594_s10  }
  0x1b   : > { %s422_s24 = sshll.u32 (!%p185_p12), %s703_s23, 4  ;;  %s191_s25 = scalar_lea.sflag (!%p185_p12), [#allocation5], %s703_s23 }
  0x1c   : > { %s194_s26 = scalar_lea.vmem (!%p185_p12), [#allocation4], %s422_s24 }
  0x1d   : > { %581 = dma.done.wait (%p673_p7), %s191_s25, 256  }
  0x1e   : > { %583 = vsyncadd (%p673_p7), %s191_s25, 4294967040  ;;  %s201_s22 = scalar_lea.sflag [#allocation7], %s703_s23  ;;  %s203_s27 = scalar_lea.vmem [#allocation6], %s703_s23 }
  0x1f   : > { %585 = dma.done.wait (%p673_p7), %s201_s22, 16  }
  0x20   : > { %587 = vsyncadd (%p673_p7), %s201_s22, 4294967280  ;;  %vm239_vm0 = vcmask 516096   ;;  %v241_v0 = vlaneseq  ;;  %v614_v1 = vmov 0.0   ;;  %vm244_vm1 = vcmask 523264   ;;  %v251_v4 = vld [vmem:[%s194_s26] sm:$0xff]  ;;  %v252_v5 = vld [vmem:[%s194_s26 + $0x8] sm:$0xff] }
  0x21   : > { %240 = vst.msk [vmem:[#allocation2] sm:$0x1] %vm239_vm0, %v614_v1  ;;  %v255_v6 = vsel %vm244_vm1, %v251_v4, -inf  ;;  %v256_v7 = vsel %vm244_vm1, %v252_v5, -inf  ;;  %v489_v14 = vld [vmem:[%s203_s27] ss:$0 sm:$0xff] }
  0x22   : > { %v242_v2 = vshrl.u32 %v241_v0, 7  ;;  %v257_v8 = vmax.f32 %v255_v6, %v256_v7  ;;  %v250_v44 = vand.u32 127, %v241_v0  ;;  %p231_p13 = scmp.lt.s32.totalorder %s602_s12, 1  ;;  %vm315_vm5 = vcmask 0  }
  0x24   : > { %v243_v3 = vadd.s32 8, %v242_v2  ;;  %245 = vst.msk [vmem:[#allocation3] sm:$0xff] %vm244_vm1, %v242_v2  ;;  %v258_v9 = vrot.slane %v257_v8, 4  ;;  %vm301_vm4 = vcmp.lt.s32.totalorder %v250_v44, 64  ;;  %s765_s12 = smov (!%p231_p13, %s602_s12), 1 }
  0x25   : > { %s233_s29 = scalar_lea.vmem %s753_s2, %s765_s12 }
  0x26   : > { %246 = vst.msk [vmem:[#allocation3 + $0x8] sm:$0xff] %vm244_vm1, %v243_v3  ;;  %v259_v10 = vmax.f32 %v257_v8, %v258_v9 }
  0x28   : > { %v260_v11 = vrot.slane %v259_v10, 2  ;;  %v300_v48 = vld [vmem:[#allocation2] sm:$0x1] }
  0x2a   : > { %v261_v12 = vmax.f32 %v259_v10, %v260_v11 }
  0x2b   : > { %v282_v16 = vld [vmem:[#allocation3] sm:$0xff] }
  0x2c   : > { %v262_v13 = vrot.slane %v261_v12, 1  ;;  %vm285_vm2 = vcmp.eq.s32.totalorder %v282_v16, %v489_v14 }
  0x2d   : > { %v283_v17 = vld [vmem:[#allocation3 + $0x8] sm:$0xff]  ;;  %v287_v22 = vsel %vm285_vm2, %v251_v4, 0.0 }
  0x2e   : > { %v263_v15 = vmax.f32 %v261_v12, %v262_v13  ;;  %vm286_vm3 = vcmp.eq.s32.totalorder %v283_v17, %v489_v14  ;;  %v289_v24 = vsel %vm244_vm1, %v287_v22, 0.0 }
  0x2f   : > { %v288_v23 = vsel %vm286_vm3, %v252_v5, 0.0 }
  0x30   : > { %v264_v18 = vsub.f32 %v251_v4, %v263_v15  ;;  %v265_v19 = vsub.f32 %v252_v5, %v263_v15  ;;  %v290_v25 = vsel %vm244_vm1, %v288_v23, 0.0 }
  0x31   : > { %v291_v27 = vadd.f32 %v290_v25, %v289_v24 }
  0x32   : > { %v266_v20 = vmul.f32 1.442695, %v264_v18  ;;  %v268_v21 = vmul.f32 1.442695, %v265_v19 }
  0x33   : > { %v292_v32 = vrot.slane %v291_v27, 4 }
  0x34   : > { %490 = vpow2.f32 %v266_v20 }
  0x35   : > { %492 = vpow2.f32 %v268_v21  ;;  %v293_v35 = vadd.f32 %v292_v32, %v291_v27 }
  0x37   : > { %v294_v38 = vrot.slane %v293_v35, 2 }
  0x39   : > { %v295_v41 = vadd.f32 %v294_v38, %v293_v35 }
  0x3a   : > { %v491_v26 = vpop.eup %490 }
  0x3b   : > { %v493_v28 = vpop.eup %492  ;;  %v270_v29 = vsel %vm244_vm1, %v491_v26, 0.0  ;;  %v296_v42 = vrot.slane %v295_v41, 1 }
  0x3c   : > { %v271_v30 = vsel %vm244_vm1, %v493_v28, 0.0 }
  0x3d   : > { %v272_v31 = vadd.f32 %v271_v30, %v270_v29  ;;  %v297_v46 = vadd.f32 %v296_v42, %v295_v41 }
  0x3f   : > { %v273_v33 = vrot.slane %v272_v31, 4 }
  0x41   : > { %v274_v34 = vadd.f32 %v273_v33, %v272_v31 }
  0x43   : > { %v275_v36 = vrot.slane %v274_v34, 2 }
  0x45   : > { %v276_v37 = vadd.f32 %v275_v36, %v274_v34 }
  0x47   : > { %v277_v39 = vrot.slane %v276_v37, 1 }
  0x49   : > { %v278_v40 = vadd.f32 %v277_v39, %v276_v37 }
  0x4b   : > { %494 = vlog2.f32 %v278_v40 }
  0x51   : > { %v495_v43 = vpop.eup %494 }
  0x52   : > { %v280_v45 = vmul.f32 0.6931472, %v495_v43 }
  0x54   : > { %v281_v47 = vadd.f32 %v280_v45, %v263_v15 }
  0x56   : > { %v302_v49 = vsub.f32 %v281_v47, %v297_v46 }
  0x58   : > { %v303_v50 = vsel %vm301_vm4, %v302_v49, 0.0 }
  0x59   : > { %v304_v51 = vadd.f32 %v303_v50, %v300_v48 }
  0x5b   : > { %306 = vst.msk [vmem:[#allocation2] sm:$0x1] %vm239_vm0, %v304_v51 }
  0x62   : > { %v310_v52 = vld [vmem:[#allocation2] sm:$0x1] }
  0x63   : > { %v311_v53 = vsel %vm239_vm0, %v310_v52, 0.0 }
  0x64   : > { %312 = vadd.xlane.f32.xlu0 %v311_v53 }
  0xd7   : > { %v313_v54 = vpop.xlane.xlu0 %312 }
  0xd8   : > { %v314_v55 = vmul.f32 0.0078125, %v313_v54 }
  0xda   : > { %316 = vst.msk [vmem:[%s233_s29] sm:$0x1] %vm315_vm5, %v314_v55 }
  0xdb PF: > { %s18_s14 = sadd.s32 1, %s610_s14   ;;  %s757_s9 = smov %s594_s10 }
  0xdc   : > { %p15_p0 = scmp.ge.s32.totalorder %s18_s14, 4   ;;  %s758_s10 = smov %s598_s11 }
  0xdd   : > { %s759_s11 = smov %s679_s21  ;;  %s760_s12 = smov %s606_s13 }
  0xde   : > { %s761_s13 = smov %s763_s16  ;;  %17 = sbr.rel (!%p15_p0) target bundleno = 6 (0x6), region = 89 }
  0xe3   :  { %337 = vsyncpa [#allocation5], 1 }
  0xe4   :  { %339 = vsyncpa [#allocation5 + $0x1], 1 }
  0xe5   :  { %340 = vsyncpa [#allocation7], 1 }
  0xe6   :  { %342 = vsyncpa [#allocation7 + $0x1], 1 }

</bundles_post_ra>
